<compile_context>
chip_gen: v6e
topology: v6e:2x2x1
jax: 0.10.0
libtpu: 0.0.40
codegen_flags: <defaults>
</compile_context>

<pallas_src>
import jax
import jax.numpy as jnp
from jax.experimental import pallas as pl
from jax.experimental.pallas import tpu as pltpu

_HEAD_PAD = 128          # lane-dense fused head width ([qa(2)|sent(2)|type(3)|pad])
_GATHER_CHUNK = 8        # embedding rows DMA'd concurrently per wave


def _round_up(x, m):
    return ((x + m - 1) // m) * m


# ---------------------------------------------------------------------------
# Kernel 1: fused embedding-gather + stand-in encoder + all three heads
# ---------------------------------------------------------------------------
def _make_encoder_kernel(tm, chunk):
    def kernel(ids_ref,                     # SMEM (M_pad,) i32   (scalar prefetch)
               mask_ref,                    # VMEM (tm, 1)  f32
               emb_hbm,                     # HBM  (vocab, E) f32 (pl.ANY, raw ref)
               w_enc_ref, b_enc_ref,        # VMEM (E, E) bf16 / (1, E) f32
               w_head_ref, b_head_ref,      # VMEM (E, 128) bf16 / (1, 128) f32
               out_ref,                     # VMEM (tm, 128) f32
               x_buf,                       # VMEM scratch (tm, E) f32
               sems):                       # DMA semaphores (chunk,)
        base = pl.program_id(0) * tm
        # Gather `tm` embedding rows straight from HBM into VMEM (fused gather:
        # the gathered activation never round-trips through HBM).
        for c0 in range(0, tm, chunk):
            for r in range(chunk):
                tok = ids_ref[base + c0 + r]
                pltpu.make_async_copy(emb_hbm.at[pl.ds(tok, 1), :],
                                      x_buf.at[pl.ds(c0 + r, 1), :],
                                      sems.at[r]).start()
            for r in range(chunk):
                pltpu.make_async_copy(emb_hbm.at[pl.ds(0, 1), :],
                                      x_buf.at[pl.ds(c0 + r, 1), :],
                                      sems.at[r]).wait()
        # Stand-in encoder (dense + tanh, masked) + fused [qa|sent|type] heads.
        x = x_buf[...].astype(jnp.bfloat16)                         # MXU operand
        h = jnp.tanh(jnp.dot(x, w_enc_ref[...],
                             preferred_element_type=jnp.float32) + b_enc_ref[...])
        h = h * mask_ref[...]                                       # f32 VPU
        out_ref[...] = (jnp.dot(h.astype(jnp.bfloat16), w_head_ref[...],
                                preferred_element_type=jnp.float32)
                        + b_head_ref[...])
    return kernel


def fused_encoder_heads(ids_flat, mask2d, emb_table, w_enc, b_enc, w_head, b_head,
                        *, tile_m=512):
    M = ids_flat.shape[0]
    E = w_enc.shape[0]
    C = w_head.shape[1]
    # Row tile: multiple of 8, big enough to amortize per-step overhead, but small
    # enough that the grid has >= 2 steps whenever possible (v7x megacore split).
    tm = min(tile_m, _round_up(max(8, (M + 1) // 2), 8))
    m_pad = _round_up(M, tm)
    if m_pad != M:
        ids_flat = jnp.pad(ids_flat, (0, m_pad - M))
        mask2d = jnp.pad(mask2d, ((0, m_pad - M), (0, 0)))
    grid = (m_pad // tm,)
    chunk = min(_GATHER_CHUNK, tm)

    est_vmem = (tm * E * 4                       # gather scratch
                + 2 * tm * 4                     # mask (double buffered)
                + 2 * E * E * 2 + 2 * E * 4      # w_enc / b_enc
                + 2 * E * C * 2 + 2 * C * 4      # w_head / b_head
                + 2 * tm * C * 4)                # output (double buffered)
    vmem_limit = int(min(100 * 2**20, max(16 * 2**20, 2 * est_vmem)))

    cost = pl.CostEstimate(
        flops=int(2 * m_pad * E * (E + C)),
        transcendentals=int(m_pad * E),                              # tanh
        bytes_accessed=int(m_pad * 4 + m_pad * 4 + m_pad * E * 4
                           + w_enc.size * 2 + b_enc.size * 4
                           + w_head.size * 2 + b_head.size * 4
                           + m_pad * C * 4),
    )

    out = pl.pallas_call(
        _make_encoder_kernel(tm, chunk),
        out_shape=jax.ShapeDtypeStruct((m_pad, C), jnp.float32),
        grid_spec=pltpu.PrefetchScalarGridSpec(
            num_scalar_prefetch=1,
            grid=grid,
            in_specs=[
                pl.BlockSpec((tm, 1), lambda i, ids: (i, 0)),        # mask
                pl.BlockSpec(memory_space=pl.ANY),                   # embedding (HBM)
                pl.BlockSpec((E, E), lambda i, ids: (0, 0)),         # w_enc (invariant)
                pl.BlockSpec((1, E), lambda i, ids: (0, 0)),         # b_enc
                pl.BlockSpec((E, C), lambda i, ids: (0, 0)),         # w_head (invariant)
                pl.BlockSpec((1, C), lambda i, ids: (0, 0)),         # b_head
            ],
            out_specs=pl.BlockSpec((tm, C), lambda i, ids: (i, 0)),
            scratch_shapes=[pltpu.VMEM((tm, E), jnp.float32),
                            pltpu.SemaphoreType.DMA((chunk,))],
        ),
        compiler_params=pltpu.CompilerParams(
            dimension_semantics=("parallel",),
            vmem_limit_bytes=vmem_limit),
        cost_estimate=cost,
    )(ids_flat, mask2d, emb_table, w_enc, b_enc, w_head, b_head)
    return out[:M] if m_pad != M else out


# ---------------------------------------------------------------------------
# Kernel 2: multi-group softmax cross-entropy, reduced in-kernel
# ---------------------------------------------------------------------------
def _make_ce_kernel(group_shapes):
    G = len(group_shapes)

    def ce_kernel(*refs):
        label_refs = refs[:G]           # SMEM (n_g,) i32 ; label == -1 means ignored
        logit_refs = refs[G:2 * G]      # VMEM (n_g, c_g) f32
        out_ref = refs[2 * G]           # VMEM (1, 128) f32 lane-dense result row
        lane = jax.lax.broadcasted_iota(jnp.int32, (1, 128), 1)
        res = jnp.zeros((1, 128), jnp.float32)
        for g, (n, c) in enumerate(group_shapes):
            lg = logit_refs[g][...].astype(jnp.float32)
            m = jnp.max(lg, axis=-1, keepdims=True)
            lse = m + jnp.log(jnp.sum(jnp.exp(lg - m), axis=-1, keepdims=True))
            row = jax.lax.broadcasted_iota(jnp.int32, (n, 1), 0)
            lbl_col = jnp.full((n, 1), -1, jnp.int32)
            vld_col = jnp.zeros((n, 1), jnp.float32)
            for r in range(n):                                  # n is small & static
                lbl = label_refs[g][r]                          # SMEM scalar read
                lbl_col = jnp.where(row == r, lbl, lbl_col)
                vld_col = jnp.where(row == r,
                                    jnp.where(lbl >= 0, 1.0, 0.0), vld_col)
            col = jax.lax.broadcasted_iota(jnp.int32, (n, c), 1)
            picked = jnp.sum(jnp.where(col == lbl_col, lg, 0.0),
                             axis=-1, keepdims=True)
            loss_sum = jnp.sum((lse - picked) * vld_col)
            res = jnp.where(lane == 2 * g, loss_sum, res)
            res = jnp.where(lane == 2 * g + 1, jnp.sum(vld_col), res)
        out_ref[...] = res

    return ce_kernel


def multi_group_ce_means(groups):
    """groups: list of (logits (n_g, c_g) f32, labels (n_g,) i32 with -1 = ignored).

    One Pallas launch computes every group's masked loss-sum and valid-count
    (reduced in-kernel, lane-dense (1, 128) output; no per-row HBM writeback and
    no XLA-side pad/concat).  NOTE: torch returns NaN when every label in a group
    is ignored; we deliberately return 0 instead (divide by max(count, 1)).
    """
    G = len(groups)
    shapes = tuple(tuple(g[0].shape) for g in groups)
    labels = [g[1].astype(jnp.int32) for g in groups]
    logits = [g[0].astype(jnp.float32) for g in groups]
    out = pl.pallas_call(
        _make_ce_kernel(shapes),
        out_shape=jax.ShapeDtypeStruct((1, 128), jnp.float32),
        grid_spec=pltpu.PrefetchScalarGridSpec(
            num_scalar_prefetch=G,
            grid=(1,),
            in_specs=[pl.BlockSpec(s, lambda i, *_: (0, 0)) for s in shapes],
            out_specs=pl.BlockSpec((1, 128), lambda i, *_: (0, 0)),
        ),
        compiler_params=pltpu.CompilerParams(dimension_semantics=("arbitrary",)),
    )(*labels, *logits)
    row = out[0]
    sums = row[0:2 * G:2]
    cnts = row[1:2 * G:2]
    means = sums / jnp.maximum(cnts, 1.0)
    return [means[g] for g in range(G)]


# ---------------------------------------------------------------------------
# Parameter preparation (fuse + pad + cast ONCE, outside the per-step forward)
# ---------------------------------------------------------------------------
def prepare_reader_params(raw):
    w_all = jnp.concatenate([raw["w_qa"], raw["w_sent"], raw["w_type"]], axis=1)  # (E, 7)
    b_all = jnp.concatenate([raw["b_qa"], raw["b_sent"], raw["b_type"]])          # (7,)
    E, C = w_all.shape
    w_head = jnp.zeros((E, _HEAD_PAD), jnp.bfloat16).at[:, :C].set(
        w_all.astype(jnp.bfloat16))
    b_head = jnp.zeros((1, _HEAD_PAD), jnp.float32).at[0, :C].set(
        b_all.astype(jnp.float32))
    return {
        # Table kept f32 so single-row gather DMAs stay word-aligned.
        # TODO(synk): stage the table as u32-packed bf16 pairs to halve gather bytes.
        "embedding": raw["embedding"].astype(jnp.float32),
        "w_enc": raw["w_enc"].astype(jnp.bfloat16),
        "b_enc": raw["b_enc"].astype(jnp.float32).reshape(1, -1),
        "w_head": w_head,
        "b_head": b_head,
    }


# ---------------------------------------------------------------------------
# Reader forward (mirrors the PyTorch module's forward)
# ---------------------------------------------------------------------------
def reader_forward(params, input_ids, attention_mask, start_pos=None, end_pos=None,
                   sentence_index=None, sentence_labels=None, answer_type=None):
    B, L = input_ids.shape
    M = B * L

    ids_flat = input_ids.reshape(M).astype(jnp.int32)
    mask2d = attention_mask.astype(jnp.float32).reshape(M, 1)

    # One fused kernel: embedding gather + stand-in encoder + all three heads.
    logits2d = fused_encoder_heads(ids_flat, mask2d, params["embedding"],
                                   params["w_enc"], params["b_enc"],
                                   params["w_head"], params["b_head"])   # (M, 128)
    logits = logits2d.reshape(B, L, _HEAD_PAD)

    start_qa_logits = logits[:, :, 0]                          # (B, L)
    end_qa_logits = logits[:, :, 1]                            # (B, L)
    ret = {"start_qa_logits": start_qa_logits, "end_qa_logits": end_qa_logits}

    # Collect all cross-entropy groups -> single CE kernel launch. Label -1 == ignored.
    ce_groups = []
    if start_pos is not None and end_pos is not None:
        ignored_idx = L                                        # torch: ignore_index = L
        sp = jnp.clip(start_pos, 0, ignored_idx)
        ep = jnp.clip(end_pos, 0, ignored_idx)
        ce_groups.append(("start", start_qa_logits, jnp.where(sp == ignored_idx, -1, sp)))
        ce_groups.append(("end", end_qa_logits, jnp.where(ep == ignored_idx, -1, ep)))

    if sentence_index is not None:
        # linear-then-gather == gather-then-linear for a rowwise linear head
        sentence_select = logits2d[:, 2:4][sentence_index]     # (Ns, 2)
        ret["sentence_select"] = sentence_select
        if sentence_labels is not None:
            ce_groups.append(("sentence", sentence_select,
                              jnp.where(sentence_labels == -100, -1, sentence_labels)))

    if answer_type is not None:
        output_answer_type = logits[:, 0, 4:7]                 # CLS-token head, (B, 3)
        ret["output_answer_type"] = output_answer_type
        ce_groups.append(("type", output_answer_type,
                          jnp.where(answer_type == -100, -1, answer_type)))

    by_name = {}
    if ce_groups:
        means = multi_group_ce_means([(lg, lb) for _, lg, lb in ce_groups])
        by_name = {name: m for (name, _, _), m in zip(ce_groups, means)}

    ans_span_loss = None
    sentence_loss = None
    ans_type_loss = None
    if "start" in by_name:
        ans_span_loss = (by_name["start"] + by_name["end"]) / 2.0
        ret["ans_span_loss"] = ans_span_loss
    if "sentence" in by_name:
        sentence_loss = by_name["sentence"]
        ret["sentence_loss"] = sentence_loss
    if "type" in by_name:
        ans_type_loss = by_name["type"]
        ret["ans_type_loss"] = ans_type_loss

    if sentence_loss is not None:
        # Guarded vs. the torch code (which would crash adding None tensors) when
        # span / answer_type losses are absent: missing terms contribute 0.
        span_term = ans_span_loss if ans_span_loss is not None else 0.0
        type_term = ans_type_loss if ans_type_loss is not None else 0.0
        loss = 0.2 * span_term + sentence_loss + type_term
    else:
        loss = ans_span_loss
    ret["loss"] = loss
    return ret


# ---------------------------------------------------------------------------
if __name__ == "__main__":
    B, L, E, vocab, Ns = 2, 8, 32, 64, 4

    key = jax.random.PRNGKey(0)
    ks = jax.random.split(key, 12)

    raw_params = {
        "embedding": jax.random.normal(ks[0], (vocab, E), jnp.float32) * 0.1,
        "w_enc": jax.random.normal(ks[1], (E, E), jnp.float32) * 0.1,
        "b_enc": jnp.zeros((1, E), jnp.float32),
        "w_qa": jax.random.normal(ks[2], (E, 2), jnp.float32) * 0.1,
        "b_qa": jnp.zeros((2,), jnp.float32),
        "w_sent": jax.random.normal(ks[3], (E, 2), jnp.float32) * 0.1,
        "b_sent": jnp.zeros((2,), jnp.float32),
        "w_type": jax.random.normal(ks[4], (E, 3), jnp.float32) * 0.1,
        "b_type": jnp.zeros((3,), jnp.float32),
    }
    params = prepare_reader_params(raw_params)   # fuse/pad/cast once, not per forward

    input_ids = jax.random.randint(ks[5], (B, L), 0, vocab, dtype=jnp.int32)
    attention_mask = jnp.ones((B, L), jnp.int32).at[1, L - 2:].set(0)
    start_pos = jax.random.randint(ks[6], (B,), 0, L, dtype=jnp.int32)
    end_pos = jax.random.randint(ks[7], (B,), 0, L, dtype=jnp.int32)
    sentence_index = jax.random.randint(ks[8], (Ns,), 0, B * L, dtype=jnp.int32)
    sentence_labels = jax.random.randint(ks[9], (Ns,), 0, 2, dtype=jnp.int32)
    answer_type = jax.random.randint(ks[10], (B,), 0, 3, dtype=jnp.int32)

    out = reader_forward(params, input_ids, attention_mask,
                         start_pos=start_pos, end_pos=end_pos,
                         sentence_index=sentence_index,
                         sentence_labels=sentence_labels,
                         answer_type=answer_type)
    jax.block_until_ready(out["loss"])
    assert out["start_qa_logits"].shape == (B, L)
    assert out["end_qa_logits"].shape == (B, L)
    assert out["sentence_select"].shape == (Ns, 2)
    assert out["output_answer_type"].shape == (B, 3)
    assert jnp.isfinite(out["loss"])
    print("KERNEL_OK")
</pallas_src>

<mosaic_0001>
module attributes {stable_mosaic.version = 11 : i64} {
  func.func @kernel(%arg0: i32, %arg1: memref<16xi32, #tpu.memory_space<smem>>, %arg2: memref<8x1xf32, #tpu.memory_space<vmem>>, %arg3: memref<64x32xf32, #tpu.memory_space<any>>, %arg4: memref<32x32xbf16, #tpu.memory_space<vmem>>, %arg5: memref<1x32xf32, #tpu.memory_space<vmem>>, %arg6: memref<32x128xbf16, #tpu.memory_space<vmem>>, %arg7: memref<1x128xf32, #tpu.memory_space<vmem>>, %arg8: memref<8x128xf32, #tpu.memory_space<vmem>>, %arg9: memref<8x32xf32, #tpu.memory_space<vmem>>, %arg10: memref<8x!tpu.dma_semaphore, #tpu.memory_space<semaphore_mem>>) attributes {dimension_semantics = [#tpu.dimension_semantics<parallel>], iteration_bounds = array<i64: 2>, scalar_prefetch = 1 : i64, scratch_operands = 2 : i64, tpu.core_type = #tpu.core_type<tc>, window_params = [{transform_indices = @transform_0, window_bounds = array<i64: 8, 1>}, {}, {pipeline_mode = #tpu.pipeline_mode<synchronous>, transform_indices = @transform_2, window_bounds = array<i64: 32, 32>}, {pipeline_mode = #tpu.pipeline_mode<synchronous>, transform_indices = @transform_3, window_bounds = array<i64: 1, 32>}, {pipeline_mode = #tpu.pipeline_mode<synchronous>, transform_indices = @transform_4, window_bounds = array<i64: 32, 128>}, {pipeline_mode = #tpu.pipeline_mode<synchronous>, transform_indices = @transform_5, window_bounds = array<i64: 1, 128>}, {transform_indices = @transform_6, window_bounds = array<i64: 8, 128>}]} {
    %c8_i32 = arith.constant 8 : i32
    %0 = arith.muli %arg0, %c8_i32 : i32
    %c0_i32 = arith.constant 0 : i32
    %1 = arith.addi %0, %c0_i32 : i32
    %c0_i32_0 = arith.constant 0 : i32
    %2 = arith.addi %1, %c0_i32_0 : i32
    %3 = arith.index_cast %2 : i32 to index
    %4 = memref.load %arg1[%3] : memref<16xi32, #tpu.memory_space<smem>>
    %c0_i32_1 = arith.constant 0 : i32
    %c0_i32_2 = arith.constant 0 : i32
    %5 = tpu.memref_slice %arg3[%4, %c0_i32_2] : memref<64x32xf32, #tpu.memory_space<any>> -> memref<1x32xf32, #tpu.memory_space<any>>
    %c0_i32_3 = arith.constant 0 : i32
    %c0_i32_4 = arith.constant 0 : i32
    %6 = tpu.memref_slice %arg9[%c0_i32_3, %c0_i32_4] : memref<8x32xf32, #tpu.memory_space<vmem>> -> memref<1x32xf32, #tpu.memory_space<vmem>>
    %7 = tpu.memref_slice %arg10[%c0_i32_1] : memref<8x!tpu.dma_semaphore, #tpu.memory_space<semaphore_mem>> -> memref<1x!tpu.dma_semaphore, #tpu.memory_space<semaphore_mem>>
    %8 = tpu.memref_squeeze %7 : memref<1x!tpu.dma_semaphore, #tpu.memory_space<semaphore_mem>> -> memref<!tpu.dma_semaphore, #tpu.memory_space<semaphore_mem>>
    tpu.enqueue_dma source(%5 : memref<1x32xf32, #tpu.memory_space<any>>) target(%6 : memref<1x32xf32, #tpu.memory_space<vmem>>) target_semaphore(%8 : memref<!tpu.dma_semaphore, #tpu.memory_space<semaphore_mem>>)
    %c0_i32_5 = arith.constant 0 : i32
    %9 = arith.addi %0, %c0_i32_5 : i32
    %c1_i32 = arith.constant 1 : i32
    %10 = arith.addi %9, %c1_i32 : i32
    %11 = arith.index_cast %10 : i32 to index
    %12 = memref.load %arg1[%11] : memref<16xi32, #tpu.memory_space<smem>>
    %c1_i32_6 = arith.constant 1 : i32
    %c0_i32_7 = arith.constant 0 : i32
    %13 = tpu.memref_slice %arg3[%12, %c0_i32_7] : memref<64x32xf32, #tpu.memory_space<any>> -> memref<1x32xf32, #tpu.memory_space<any>>
    %c1_i32_8 = arith.constant 1 : i32
    %c0_i32_9 = arith.constant 0 : i32
    %14 = tpu.memref_slice %arg9[%c1_i32_8, %c0_i32_9] : memref<8x32xf32, #tpu.memory_space<vmem>> -> memref<1x32xf32, #tpu.memory_space<vmem>>
    %15 = tpu.memref_slice %arg10[%c1_i32_6] : memref<8x!tpu.dma_semaphore, #tpu.memory_space<semaphore_mem>> -> memref<1x!tpu.dma_semaphore, #tpu.memory_space<semaphore_mem>>
    %16 = tpu.memref_squeeze %15 : memref<1x!tpu.dma_semaphore, #tpu.memory_space<semaphore_mem>> -> memref<!tpu.dma_semaphore, #tpu.memory_space<semaphore_mem>>
    tpu.enqueue_dma source(%13 : memref<1x32xf32, #tpu.memory_space<any>>) target(%14 : memref<1x32xf32, #tpu.memory_space<vmem>>) target_semaphore(%16 : memref<!tpu.dma_semaphore, #tpu.memory_space<semaphore_mem>>)
    %c0_i32_10 = arith.constant 0 : i32
    %17 = arith.addi %0, %c0_i32_10 : i32
    %c2_i32 = arith.constant 2 : i32
    %18 = arith.addi %17, %c2_i32 : i32
    %19 = arith.index_cast %18 : i32 to index
    %20 = memref.load %arg1[%19] : memref<16xi32, #tpu.memory_space<smem>>
    %c2_i32_11 = arith.constant 2 : i32
    %c0_i32_12 = arith.constant 0 : i32
    %21 = tpu.memref_slice %arg3[%20, %c0_i32_12] : memref<64x32xf32, #tpu.memory_space<any>> -> memref<1x32xf32, #tpu.memory_space<any>>
    %c2_i32_13 = arith.constant 2 : i32
    %c0_i32_14 = arith.constant 0 : i32
    %22 = tpu.memref_slice %arg9[%c2_i32_13, %c0_i32_14] : memref<8x32xf32, #tpu.memory_space<vmem>> -> memref<1x32xf32, #tpu.memory_space<vmem>>
    %23 = tpu.memref_slice %arg10[%c2_i32_11] : memref<8x!tpu.dma_semaphore, #tpu.memory_space<semaphore_mem>> -> memref<1x!tpu.dma_semaphore, #tpu.memory_space<semaphore_mem>>
    %24 = tpu.memref_squeeze %23 : memref<1x!tpu.dma_semaphore, #tpu.memory_space<semaphore_mem>> -> memref<!tpu.dma_semaphore, #tpu.memory_space<semaphore_mem>>
    tpu.enqueue_dma source(%21 : memref<1x32xf32, #tpu.memory_space<any>>) target(%22 : memref<1x32xf32, #tpu.memory_space<vmem>>) target_semaphore(%24 : memref<!tpu.dma_semaphore, #tpu.memory_space<semaphore_mem>>)
    %c0_i32_15 = arith.constant 0 : i32
    %25 = arith.addi %0, %c0_i32_15 : i32
    %c3_i32 = arith.constant 3 : i32
    %26 = arith.addi %25, %c3_i32 : i32
    %27 = arith.index_cast %26 : i32 to index
    %28 = memref.load %arg1[%27] : memref<16xi32, #tpu.memory_space<smem>>
    %c3_i32_16 = arith.constant 3 : i32
    %c0_i32_17 = arith.constant 0 : i32
    %29 = tpu.memref_slice %arg3[%28, %c0_i32_17] : memref<64x32xf32, #tpu.memory_space<any>> -> memref<1x32xf32, #tpu.memory_space<any>>
    %c3_i32_18 = arith.constant 3 : i32
    %c0_i32_19 = arith.constant 0 : i32
    %30 = tpu.memref_slice %arg9[%c3_i32_18, %c0_i32_19] : memref<8x32xf32, #tpu.memory_space<vmem>> -> memref<1x32xf32, #tpu.memory_space<vmem>>
    %31 = tpu.memref_slice %arg10[%c3_i32_16] : memref<8x!tpu.dma_semaphore, #tpu.memory_space<semaphore_mem>> -> memref<1x!tpu.dma_semaphore, #tpu.memory_space<semaphore_mem>>
    %32 = tpu.memref_squeeze %31 : memref<1x!tpu.dma_semaphore, #tpu.memory_space<semaphore_mem>> -> memref<!tpu.dma_semaphore, #tpu.memory_space<semaphore_mem>>
    tpu.enqueue_dma source(%29 : memref<1x32xf32, #tpu.memory_space<any>>) target(%30 : memref<1x32xf32, #tpu.memory_space<vmem>>) target_semaphore(%32 : memref<!tpu.dma_semaphore, #tpu.memory_space<semaphore_mem>>)
    %c0_i32_20 = arith.constant 0 : i32
    %33 = arith.addi %0, %c0_i32_20 : i32
    %c4_i32 = arith.constant 4 : i32
    %34 = arith.addi %33, %c4_i32 : i32
    %35 = arith.index_cast %34 : i32 to index
    %36 = memref.load %arg1[%35] : memref<16xi32, #tpu.memory_space<smem>>
    %c4_i32_21 = arith.constant 4 : i32
    %c0_i32_22 = arith.constant 0 : i32
    %37 = tpu.memref_slice %arg3[%36, %c0_i32_22] : memref<64x32xf32, #tpu.memory_space<any>> -> memref<1x32xf32, #tpu.memory_space<any>>
    %c4_i32_23 = arith.constant 4 : i32
    %c0_i32_24 = arith.constant 0 : i32
    %38 = tpu.memref_slice %arg9[%c4_i32_23, %c0_i32_24] : memref<8x32xf32, #tpu.memory_space<vmem>> -> memref<1x32xf32, #tpu.memory_space<vmem>>
    %39 = tpu.memref_slice %arg10[%c4_i32_21] : memref<8x!tpu.dma_semaphore, #tpu.memory_space<semaphore_mem>> -> memref<1x!tpu.dma_semaphore, #tpu.memory_space<semaphore_mem>>
    %40 = tpu.memref_squeeze %39 : memref<1x!tpu.dma_semaphore, #tpu.memory_space<semaphore_mem>> -> memref<!tpu.dma_semaphore, #tpu.memory_space<semaphore_mem>>
    tpu.enqueue_dma source(%37 : memref<1x32xf32, #tpu.memory_space<any>>) target(%38 : memref<1x32xf32, #tpu.memory_space<vmem>>) target_semaphore(%40 : memref<!tpu.dma_semaphore, #tpu.memory_space<semaphore_mem>>)
    %c0_i32_25 = arith.constant 0 : i32
    %41 = arith.addi %0, %c0_i32_25 : i32
    %c5_i32 = arith.constant 5 : i32
    %42 = arith.addi %41, %c5_i32 : i32
    %43 = arith.index_cast %42 : i32 to index
    %44 = memref.load %arg1[%43] : memref<16xi32, #tpu.memory_space<smem>>
    %c5_i32_26 = arith.constant 5 : i32
    %c0_i32_27 = arith.constant 0 : i32
    %45 = tpu.memref_slice %arg3[%44, %c0_i32_27] : memref<64x32xf32, #tpu.memory_space<any>> -> memref<1x32xf32, #tpu.memory_space<any>>
    %c5_i32_28 = arith.constant 5 : i32
    %c0_i32_29 = arith.constant 0 : i32
    %46 = tpu.memref_slice %arg9[%c5_i32_28, %c0_i32_29] : memref<8x32xf32, #tpu.memory_space<vmem>> -> memref<1x32xf32, #tpu.memory_space<vmem>>
    %47 = tpu.memref_slice %arg10[%c5_i32_26] : memref<8x!tpu.dma_semaphore, #tpu.memory_space<semaphore_mem>> -> memref<1x!tpu.dma_semaphore, #tpu.memory_space<semaphore_mem>>
    %48 = tpu.memref_squeeze %47 : memref<1x!tpu.dma_semaphore, #tpu.memory_space<semaphore_mem>> -> memref<!tpu.dma_semaphore, #tpu.memory_space<semaphore_mem>>
    tpu.enqueue_dma source(%45 : memref<1x32xf32, #tpu.memory_space<any>>) target(%46 : memref<1x32xf32, #tpu.memory_space<vmem>>) target_semaphore(%48 : memref<!tpu.dma_semaphore, #tpu.memory_space<semaphore_mem>>)
    %c0_i32_30 = arith.constant 0 : i32
    %49 = arith.addi %0, %c0_i32_30 : i32
    %c6_i32 = arith.constant 6 : i32
    %50 = arith.addi %49, %c6_i32 : i32
    %51 = arith.index_cast %50 : i32 to index
    %52 = memref.load %arg1[%51] : memref<16xi32, #tpu.memory_space<smem>>
    %c6_i32_31 = arith.constant 6 : i32
    %c0_i32_32 = arith.constant 0 : i32
    %53 = tpu.memref_slice %arg3[%52, %c0_i32_32] : memref<64x32xf32, #tpu.memory_space<any>> -> memref<1x32xf32, #tpu.memory_space<any>>
    %c6_i32_33 = arith.constant 6 : i32
    %c0_i32_34 = arith.constant 0 : i32
    %54 = tpu.memref_slice %arg9[%c6_i32_33, %c0_i32_34] : memref<8x32xf32, #tpu.memory_space<vmem>> -> memref<1x32xf32, #tpu.memory_space<vmem>>
    %55 = tpu.memref_slice %arg10[%c6_i32_31] : memref<8x!tpu.dma_semaphore, #tpu.memory_space<semaphore_mem>> -> memref<1x!tpu.dma_semaphore, #tpu.memory_space<semaphore_mem>>
    %56 = tpu.memref_squeeze %55 : memref<1x!tpu.dma_semaphore, #tpu.memory_space<semaphore_mem>> -> memref<!tpu.dma_semaphore, #tpu.memory_space<semaphore_mem>>
    tpu.enqueue_dma source(%53 : memref<1x32xf32, #tpu.memory_space<any>>) target(%54 : memref<1x32xf32, #tpu.memory_space<vmem>>) target_semaphore(%56 : memref<!tpu.dma_semaphore, #tpu.memory_space<semaphore_mem>>)
    %c0_i32_35 = arith.constant 0 : i32
    %57 = arith.addi %0, %c0_i32_35 : i32
    %c7_i32 = arith.constant 7 : i32
    %58 = arith.addi %57, %c7_i32 : i32
    %59 = arith.index_cast %58 : i32 to index
    %60 = memref.load %arg1[%59] : memref<16xi32, #tpu.memory_space<smem>>
    %c7_i32_36 = arith.constant 7 : i32
    %c0_i32_37 = arith.constant 0 : i32
    %61 = tpu.memref_slice %arg3[%60, %c0_i32_37] : memref<64x32xf32, #tpu.memory_space<any>> -> memref<1x32xf32, #tpu.memory_space<any>>
    %c7_i32_38 = arith.constant 7 : i32
    %c0_i32_39 = arith.constant 0 : i32
    %62 = tpu.memref_slice %arg9[%c7_i32_38, %c0_i32_39] : memref<8x32xf32, #tpu.memory_space<vmem>> -> memref<1x32xf32, #tpu.memory_space<vmem>>
    %63 = tpu.memref_slice %arg10[%c7_i32_36] : memref<8x!tpu.dma_semaphore, #tpu.memory_space<semaphore_mem>> -> memref<1x!tpu.dma_semaphore, #tpu.memory_space<semaphore_mem>>
    %64 = tpu.memref_squeeze %63 : memref<1x!tpu.dma_semaphore, #tpu.memory_space<semaphore_mem>> -> memref<!tpu.dma_semaphore, #tpu.memory_space<semaphore_mem>>
    tpu.enqueue_dma source(%61 : memref<1x32xf32, #tpu.memory_space<any>>) target(%62 : memref<1x32xf32, #tpu.memory_space<vmem>>) target_semaphore(%64 : memref<!tpu.dma_semaphore, #tpu.memory_space<semaphore_mem>>)
    %c0_i32_40 = arith.constant 0 : i32
    %c0_i32_41 = arith.constant 0 : i32
    %c0_i32_42 = arith.constant 0 : i32
    %65 = tpu.memref_slice %arg3[%c0_i32_41, %c0_i32_42] : memref<64x32xf32, #tpu.memory_space<any>> -> memref<1x32xf32, #tpu.memory_space<any>>
    %c0_i32_43 = arith.constant 0 : i32
    %c0_i32_44 = arith.constant 0 : i32
    %66 = tpu.memref_slice %arg9[%c0_i32_43, %c0_i32_44] : memref<8x32xf32, #tpu.memory_space<vmem>> -> memref<1x32xf32, #tpu.memory_space<vmem>>
    %67 = tpu.memref_slice %arg10[%c0_i32_40] : memref<8x!tpu.dma_semaphore, #tpu.memory_space<semaphore_mem>> -> memref<1x!tpu.dma_semaphore, #tpu.memory_space<semaphore_mem>>
    %68 = tpu.memref_squeeze %67 : memref<1x!tpu.dma_semaphore, #tpu.memory_space<semaphore_mem>> -> memref<!tpu.dma_semaphore, #tpu.memory_space<semaphore_mem>>
    tpu.wait_dma2 semaphore(%68 : memref<!tpu.dma_semaphore, #tpu.memory_space<semaphore_mem>>) src(%65 : memref<1x32xf32, #tpu.memory_space<any>>) dst(%66 : memref<1x32xf32, #tpu.memory_space<vmem>>)
    %c1_i32_45 = arith.constant 1 : i32
    %c0_i32_46 = arith.constant 0 : i32
    %c0_i32_47 = arith.constant 0 : i32
    %69 = tpu.memref_slice %arg3[%c0_i32_46, %c0_i32_47] : memref<64x32xf32, #tpu.memory_space<any>> -> memref<1x32xf32, #tpu.memory_space<any>>
    %c1_i32_48 = arith.constant 1 : i32
    %c0_i32_49 = arith.constant 0 : i32
    %70 = tpu.memref_slice %arg9[%c1_i32_48, %c0_i32_49] : memref<8x32xf32, #tpu.memory_space<vmem>> -> memref<1x32xf32, #tpu.memory_space<vmem>>
    %71 = tpu.memref_slice %arg10[%c1_i32_45] : memref<8x!tpu.dma_semaphore, #tpu.memory_space<semaphore_mem>> -> memref<1x!tpu.dma_semaphore, #tpu.memory_space<semaphore_mem>>
    %72 = tpu.memref_squeeze %71 : memref<1x!tpu.dma_semaphore, #tpu.memory_space<semaphore_mem>> -> memref<!tpu.dma_semaphore, #tpu.memory_space<semaphore_mem>>
    tpu.wait_dma2 semaphore(%72 : memref<!tpu.dma_semaphore, #tpu.memory_space<semaphore_mem>>) src(%69 : memref<1x32xf32, #tpu.memory_space<any>>) dst(%70 : memref<1x32xf32, #tpu.memory_space<vmem>>)
    %c2_i32_50 = arith.constant 2 : i32
    %c0_i32_51 = arith.constant 0 : i32
    %c0_i32_52 = arith.constant 0 : i32
    %73 = tpu.memref_slice %arg3[%c0_i32_51, %c0_i32_52] : memref<64x32xf32, #tpu.memory_space<any>> -> memref<1x32xf32, #tpu.memory_space<any>>
    %c2_i32_53 = arith.constant 2 : i32
    %c0_i32_54 = arith.constant 0 : i32
    %74 = tpu.memref_slice %arg9[%c2_i32_53, %c0_i32_54] : memref<8x32xf32, #tpu.memory_space<vmem>> -> memref<1x32xf32, #tpu.memory_space<vmem>>
    %75 = tpu.memref_slice %arg10[%c2_i32_50] : memref<8x!tpu.dma_semaphore, #tpu.memory_space<semaphore_mem>> -> memref<1x!tpu.dma_semaphore, #tpu.memory_space<semaphore_mem>>
    %76 = tpu.memref_squeeze %75 : memref<1x!tpu.dma_semaphore, #tpu.memory_space<semaphore_mem>> -> memref<!tpu.dma_semaphore, #tpu.memory_space<semaphore_mem>>
    tpu.wait_dma2 semaphore(%76 : memref<!tpu.dma_semaphore, #tpu.memory_space<semaphore_mem>>) src(%73 : memref<1x32xf32, #tpu.memory_space<any>>) dst(%74 : memref<1x32xf32, #tpu.memory_space<vmem>>)
    %c3_i32_55 = arith.constant 3 : i32
    %c0_i32_56 = arith.constant 0 : i32
    %c0_i32_57 = arith.constant 0 : i32
    %77 = tpu.memref_slice %arg3[%c0_i32_56, %c0_i32_57] : memref<64x32xf32, #tpu.memory_space<any>> -> memref<1x32xf32, #tpu.memory_space<any>>
    %c3_i32_58 = arith.constant 3 : i32
    %c0_i32_59 = arith.constant 0 : i32
    %78 = tpu.memref_slice %arg9[%c3_i32_58, %c0_i32_59] : memref<8x32xf32, #tpu.memory_space<vmem>> -> memref<1x32xf32, #tpu.memory_space<vmem>>
    %79 = tpu.memref_slice %arg10[%c3_i32_55] : memref<8x!tpu.dma_semaphore, #tpu.memory_space<semaphore_mem>> -> memref<1x!tpu.dma_semaphore, #tpu.memory_space<semaphore_mem>>
    %80 = tpu.memref_squeeze %79 : memref<1x!tpu.dma_semaphore, #tpu.memory_space<semaphore_mem>> -> memref<!tpu.dma_semaphore, #tpu.memory_space<semaphore_mem>>
    tpu.wait_dma2 semaphore(%80 : memref<!tpu.dma_semaphore, #tpu.memory_space<semaphore_mem>>) src(%77 : memref<1x32xf32, #tpu.memory_space<any>>) dst(%78 : memref<1x32xf32, #tpu.memory_space<vmem>>)
    %c4_i32_60 = arith.constant 4 : i32
    %c0_i32_61 = arith.constant 0 : i32
    %c0_i32_62 = arith.constant 0 : i32
    %81 = tpu.memref_slice %arg3[%c0_i32_61, %c0_i32_62] : memref<64x32xf32, #tpu.memory_space<any>> -> memref<1x32xf32, #tpu.memory_space<any>>
    %c4_i32_63 = arith.constant 4 : i32
    %c0_i32_64 = arith.constant 0 : i32
    %82 = tpu.memref_slice %arg9[%c4_i32_63, %c0_i32_64] : memref<8x32xf32, #tpu.memory_space<vmem>> -> memref<1x32xf32, #tpu.memory_space<vmem>>
    %83 = tpu.memref_slice %arg10[%c4_i32_60] : memref<8x!tpu.dma_semaphore, #tpu.memory_space<semaphore_mem>> -> memref<1x!tpu.dma_semaphore, #tpu.memory_space<semaphore_mem>>
    %84 = tpu.memref_squeeze %83 : memref<1x!tpu.dma_semaphore, #tpu.memory_space<semaphore_mem>> -> memref<!tpu.dma_semaphore, #tpu.memory_space<semaphore_mem>>
    tpu.wait_dma2 semaphore(%84 : memref<!tpu.dma_semaphore, #tpu.memory_space<semaphore_mem>>) src(%81 : memref<1x32xf32, #tpu.memory_space<any>>) dst(%82 : memref<1x32xf32, #tpu.memory_space<vmem>>)
    %c5_i32_65 = arith.constant 5 : i32
    %c0_i32_66 = arith.constant 0 : i32
    %c0_i32_67 = arith.constant 0 : i32
    %85 = tpu.memref_slice %arg3[%c0_i32_66, %c0_i32_67] : memref<64x32xf32, #tpu.memory_space<any>> -> memref<1x32xf32, #tpu.memory_space<any>>
    %c5_i32_68 = arith.constant 5 : i32
    %c0_i32_69 = arith.constant 0 : i32
    %86 = tpu.memref_slice %arg9[%c5_i32_68, %c0_i32_69] : memref<8x32xf32, #tpu.memory_space<vmem>> -> memref<1x32xf32, #tpu.memory_space<vmem>>
    %87 = tpu.memref_slice %arg10[%c5_i32_65] : memref<8x!tpu.dma_semaphore, #tpu.memory_space<semaphore_mem>> -> memref<1x!tpu.dma_semaphore, #tpu.memory_space<semaphore_mem>>
    %88 = tpu.memref_squeeze %87 : memref<1x!tpu.dma_semaphore, #tpu.memory_space<semaphore_mem>> -> memref<!tpu.dma_semaphore, #tpu.memory_space<semaphore_mem>>
    tpu.wait_dma2 semaphore(%88 : memref<!tpu.dma_semaphore, #tpu.memory_space<semaphore_mem>>) src(%85 : memref<1x32xf32, #tpu.memory_space<any>>) dst(%86 : memref<1x32xf32, #tpu.memory_space<vmem>>)
    %c6_i32_70 = arith.constant 6 : i32
    %c0_i32_71 = arith.constant 0 : i32
    %c0_i32_72 = arith.constant 0 : i32
    %89 = tpu.memref_slice %arg3[%c0_i32_71, %c0_i32_72] : memref<64x32xf32, #tpu.memory_space<any>> -> memref<1x32xf32, #tpu.memory_space<any>>
    %c6_i32_73 = arith.constant 6 : i32
    %c0_i32_74 = arith.constant 0 : i32
    %90 = tpu.memref_slice %arg9[%c6_i32_73, %c0_i32_74] : memref<8x32xf32, #tpu.memory_space<vmem>> -> memref<1x32xf32, #tpu.memory_space<vmem>>
    %91 = tpu.memref_slice %arg10[%c6_i32_70] : memref<8x!tpu.dma_semaphore, #tpu.memory_space<semaphore_mem>> -> memref<1x!tpu.dma_semaphore, #tpu.memory_space<semaphore_mem>>
    %92 = tpu.memref_squeeze %91 : memref<1x!tpu.dma_semaphore, #tpu.memory_space<semaphore_mem>> -> memref<!tpu.dma_semaphore, #tpu.memory_space<semaphore_mem>>
    tpu.wait_dma2 semaphore(%92 : memref<!tpu.dma_semaphore, #tpu.memory_space<semaphore_mem>>) src(%89 : memref<1x32xf32, #tpu.memory_space<any>>) dst(%90 : memref<1x32xf32, #tpu.memory_space<vmem>>)
    %c7_i32_75 = arith.constant 7 : i32
    %c0_i32_76 = arith.constant 0 : i32
    %c0_i32_77 = arith.constant 0 : i32
    %93 = tpu.memref_slice %arg3[%c0_i32_76, %c0_i32_77] : memref<64x32xf32, #tpu.memory_space<any>> -> memref<1x32xf32, #tpu.memory_space<any>>
    %c7_i32_78 = arith.constant 7 : i32
    %c0_i32_79 = arith.constant 0 : i32
    %94 = tpu.memref_slice %arg9[%c7_i32_78, %c0_i32_79] : memref<8x32xf32, #tpu.memory_space<vmem>> -> memref<1x32xf32, #tpu.memory_space<vmem>>
    %95 = tpu.memref_slice %arg10[%c7_i32_75] : memref<8x!tpu.dma_semaphore, #tpu.memory_space<semaphore_mem>> -> memref<1x!tpu.dma_semaphore, #tpu.memory_space<semaphore_mem>>
    %96 = tpu.memref_squeeze %95 : memref<1x!tpu.dma_semaphore, #tpu.memory_space<semaphore_mem>> -> memref<!tpu.dma_semaphore, #tpu.memory_space<semaphore_mem>>
    tpu.wait_dma2 semaphore(%96 : memref<!tpu.dma_semaphore, #tpu.memory_space<semaphore_mem>>) src(%93 : memref<1x32xf32, #tpu.memory_space<any>>) dst(%94 : memref<1x32xf32, #tpu.memory_space<vmem>>)
    %c0 = arith.constant 0 : index
    %c0_80 = arith.constant 0 : index
    %97 = vector.load %arg9[%c0, %c0_80] : memref<8x32xf32, #tpu.memory_space<vmem>>, vector<8x32xf32>
    %98 = arith.truncf %97 : vector<8x32xf32> to vector<8x32xbf16>
    %c0_81 = arith.constant 0 : index
    %c0_82 = arith.constant 0 : index
    %99 = vector.load %arg4[%c0_81, %c0_82] : memref<32x32xbf16, #tpu.memory_space<vmem>>, vector<32x32xbf16>
    %cst = arith.constant dense<0.000000e+00> : vector<8x32xf32>
    %100 = tpu.matmul %98, %99, %cst {dimension_numbers = #tpu.dot_dimension_numbers<[1], [0], [0], [1], [0, 0, 1, 1], [], []>} : vector<8x32xbf16>, vector<32x32xbf16>, vector<8x32xf32> -> vector<8x32xf32>
    %c0_83 = arith.constant 0 : index
    %c0_84 = arith.constant 0 : index
    %101 = vector.load %arg5[%c0_83, %c0_84] : memref<1x32xf32, #tpu.memory_space<vmem>>, vector<1x32xf32>
    %102 = vector.broadcast %101 : vector<1x32xf32> to vector<8x32xf32>
    %103 = arith.addf %100, %102 : vector<8x32xf32>
    %104 = math.tanh %103 : vector<8x32xf32>
    %c0_85 = arith.constant 0 : index
    %c0_86 = arith.constant 0 : index
    %105 = vector.load %arg2[%c0_85, %c0_86] : memref<8x1xf32, #tpu.memory_space<vmem>>, vector<8x1xf32>
    %106 = vector.broadcast %105 : vector<8x1xf32> to vector<8x32xf32>
    %107 = arith.mulf %104, %106 : vector<8x32xf32>
    %108 = arith.truncf %107 : vector<8x32xf32> to vector<8x32xbf16>
    %c0_87 = arith.constant 0 : index
    %c0_88 = arith.constant 0 : index
    %109 = vector.load %arg6[%c0_87, %c0_88] : memref<32x128xbf16, #tpu.memory_space<vmem>>, vector<32x128xbf16>
    %cst_89 = arith.constant dense<0.000000e+00> : vector<8x128xf32>
    %110 = tpu.matmul %108, %109, %cst_89 {dimension_numbers = #tpu.dot_dimension_numbers<[1], [0], [0], [1], [0, 0, 1, 1], [], []>} : vector<8x32xbf16>, vector<32x128xbf16>, vector<8x128xf32> -> vector<8x128xf32>
    %c0_90 = arith.constant 0 : index
    %c0_91 = arith.constant 0 : index
    %111 = vector.load %arg7[%c0_90, %c0_91] : memref<1x128xf32, #tpu.memory_space<vmem>>, vector<1x128xf32>
    %112 = vector.broadcast %111 : vector<1x128xf32> to vector<8x128xf32>
    %113 = arith.addf %110, %112 : vector<8x128xf32>
    %c0_92 = arith.constant 0 : index
    %c0_93 = arith.constant 0 : index
    %114 = vector.load %arg8[%c0_92, %c0_93] : memref<8x128xf32, #tpu.memory_space<vmem>>, vector<8x128xf32>
    tpu.vector_store %arg8[%c0_92, %c0_93], %113 {strides = array<i32>} : memref<8x128xf32, #tpu.memory_space<vmem>>, vector<8x128xf32>,
    return
  }
  func.func @transform_0(%arg0: i32, %arg1: memref<16xi32, #tpu.memory_space<smem>>) -> (i32, i32) {
    %c0_i32 = arith.constant 0 : i32
    %c0_i32_0 = arith.constant 0 : i32
    return %arg0, %c0_i32 : i32, i32
  }
  func.func @transform_2(%arg0: i32, %arg1: memref<16xi32, #tpu.memory_space<smem>>) -> (i32, i32) {
    %c0_i32 = arith.constant 0 : i32
    %c0_i32_0 = arith.constant 0 : i32
    %c0_i32_1 = arith.constant 0 : i32
    return %c0_i32, %c0_i32_0 : i32, i32
  }
  func.func @transform_3(%arg0: i32, %arg1: memref<16xi32, #tpu.memory_space<smem>>) -> (i32, i32) {
    %c0_i32 = arith.constant 0 : i32
    %c0_i32_0 = arith.constant 0 : i32
    %c0_i32_1 = arith.constant 0 : i32
    return %c0_i32, %c0_i32_0 : i32, i32
  }
  func.func @transform_4(%arg0: i32, %arg1: memref<16xi32, #tpu.memory_space<smem>>) -> (i32, i32) {
    %c0_i32 = arith.constant 0 : i32
    %c0_i32_0 = arith.constant 0 : i32
    %c0_i32_1 = arith.constant 0 : i32
    return %c0_i32, %c0_i32_0 : i32, i32
  }
  func.func @transform_5(%arg0: i32, %arg1: memref<16xi32, #tpu.memory_space<smem>>) -> (i32, i32) {
    %c0_i32 = arith.constant 0 : i32
    %c0_i32_0 = arith.constant 0 : i32
    %c0_i32_1 = arith.constant 0 : i32
    return %c0_i32, %c0_i32_0 : i32, i32
  }
  func.func @transform_6(%arg0: i32, %arg1: memref<16xi32, #tpu.memory_space<smem>>) -> (i32, i32) {
    %c0_i32 = arith.constant 0 : i32
    %c0_i32_0 = arith.constant 0 : i32
    return %arg0, %c0_i32 : i32, i32
  }
}

</mosaic_0001>

<bundles_post_ra>
// kernel: tpu_custom_call.1
= control target key start
LH: loop header
LB: loop body
LE: loop exit
PB: predicated region body
PF: predicated region fallthrough
CT: control target
= control target key end

     0   :  { %s1427_s0 = inlined_call_operand.vmem [shape: s32[16], index: 0, kind: input, shape index: {}]   ;;  %s1428_s1 = inlined_call_operand.vmem [shape: f32[16,1], index: 1, kind: input, shape index: {}]   ;;  %s1429_s2 = inlined_call_operand.vmem [shape: f32[64,32], index: 2, kind: input, shape index: {}]   ;;  %s1430_s3 = inlined_call_operand.vmem [shape: bf16[32,32], index: 3, kind: input, shape index: {}]   ;;  %s1431_s4 = inlined_call_operand.vmem [shape: f32[1,32], index: 4, kind: input, shape index: {}]   ;;  %s1432_s5 = inlined_call_operand.vmem [shape: bf16[32,128], index: 5, kind: input, shape index: {}]   ;;  %s1433_s6 = inlined_call_operand.vmem [shape: f32[1,128], index: 6, kind: input, shape index: {}]   ;;  %s1434_s7 = inlined_call_operand.hbm [shape: f32[16,128], index: 7, kind: output, shape index: {}]  }
   0x1   :  { %s12_s26 = sshll.u32 %s1427_s0, 4  ;;  %s13_s26 = int_to_ptr.vmem [resolvable:$true] %s12_s26 }
   0x2   :  { %s1119_s27 = scalar_lea.vmem %s13_s26, 16  ;;  %p1124_p1 = scmp.lt.s32.totalorder %s13_s26, %s13_s26 }
   0x3   :  { %p1120_p0 = scmp.ne.s32.totalorder %s13_s26, %s1119_s27  ;;  %p1125_p2 = scmp.lt.s32.totalorder %s1119_s27, %s1119_s27 }
   0x5   :  { %p1126_p3 = por %p1125_p2, %p1124_p1 }
   0x7   :  { %p1127_p4 = pnand %p1126_p3, %p1120_p0 }
   0x9   :  { %1130 = shalt.err (!%p1127_p4)  }
   0xa   :  { %s1211_s28 = smov [#allocation5]  }
   0xb   :  { %15 = dma.vmem_to_smem %s13_s26, 16, %s1211_s28, [#allocation4] }
   0xc   :  { %1173 = dma.done.wait [#allocation4], 16 }
   0xd   :  { %1174 = vsyncadd [#allocation4], 4294967280 }
   0xe   :  { %17 = sfence }
   0xf   :  { %18 = vsyncpa [#allocation7], 0 }
  0x10   :  { %20 = vsyncpa [#allocation7 + $0x1], 0  ;;  %s1259_s29 = smov 0   ;;  %s1261_s30 = smov 0  }
  0x11   :  { %s1263_s0 = smov 0   ;;  %s1265_s8 = smov 0  }
  0x12 LB: > { %s1280_s9 = sadd.s32 4294967295, %s1209_s8   ;;  %s1020_s10 = sadd.s32 4294967294, %s1209_s8   ;;  %s1209_s8 = sphi %s1265_s8, %s1446_s8   ;;  %s1205_s0 = sphi %s1263_s0, %s1445_s0   ;;  %s1201_s30 = sphi %s1261_s30, %s1444_s30   ;;  %s1197_s29 = sphi %s1259_s29, %s1443_s29  }
  0x13   : > { %s1284_s11 = sadd.s32 1, %s1209_s8   ;;  %s143_s12 = sadd.s32 1, %s1205_s0 }
  0x14   : > { %s140_s13 = ssub.s32 %s1209_s8, %s1284_s11  ;;  %p153_p5 = scmp.ne.s32.totalorder %s1205_s0, %s1201_s30 }
  0x15   : > { %p141_p6 = scmp.eq.s32.totalorder %s140_s13, 0  ;;  %p154_p7 = scmp.eq.s32.totalorder %s1280_s9, 1 }
  0x16   : > { %p159_p8 = scmp.ne.s32.totalorder %s1201_s30, %s1197_s29  ;;  %p160_p9 = scmp.eq.s32.totalorder %s1020_s10, 1 }
  0x17   : > { %s1295_s14 = scalar_select %p141_p6, %s1205_s0, %s143_s12  }
  0x18   : > { %p1297_p10 = por %p154_p7, %p153_p5  ;;  %p1301_p11 = por %p160_p9, %p159_p8 }
  0x19   : > { %1436 = sst [smem:[#allocation26_spill]] %s1295_s14  ;;  %p1023_p12 = scmp.ge.s32.totalorder %s1209_s8, 1 }
  0x1a   : > { %p197_p13 = scmp.lt.s32.totalorder %s1209_s8, 3 }
  0x1c   : > { %p198_p0 = pnand %p1023_p12, %p197_p13 }
  0x1d   : > { %s1435_s17 = sand.u32 (!%p198_p0), 1, %s1201_s30   ;;  %p224_p1 = scmp.lt.s32.totalorder (!%p198_p0), %s1280_s9, 1 }
  0x1e   : > { %201 = sbr.rel (%p198_p0) target bundleno = 559 (0x22f), region = 40  ;;  %s1311_s18 = sshll.u32 (!%p198_p0), %s1435_s17, 3 }
  0x1f   : > { %s1314_s19 = sshll.u32 (!%p198_p0), %s1280_s9, 3 }
  0x20   : > { %s230_s20 = sld [smem:[#allocation5 + %s1314_s19]] (!%p198_p0) }
  0x23   : > { %s225_s21 = scalar_select %p224_p1, %s1280_s9, 1 }
  0x25   : > { %s1025_s22 = sshll.u32 %s225_s21, 3 }
  0x26   : > { %s1321_s25 = scalar_lea.vmem %s1428_s1, %s1025_s22  ;;  %s231_s28 = scalar_lea.vmem %s1429_s2, %s230_s20 }
  0x27   : > { %v250_v0 = vld [vmem:[%s231_s28] sm:$0x1] }
  0x28   : > { %251 = vst [vmem:[#allocation2] sm:$0x1] %v250_v0 }
  0x29   : > { %277 = vsyncadd [#allocation3], 16  ;;  %s278_s12 = sadd.s32 1, %s1314_s19 }
  0x2a   : > { %s279_s13 = sld [smem:[#allocation5 + %s278_s12]] }
  0x30   : > { %s280_s21 = scalar_lea.vmem %s1429_s2, %s279_s13 }
  0x31   : > { %v301_v1 = vld [vmem:[%s280_s21] sm:$0x1] }
  0x32   : > { %302 = vst [vmem:[#allocation2 + $0x1] sm:$0x1] %v301_v1 }
  0x33   : > { %328 = vsyncadd [#allocation3 + $0x1], 16  ;;  %s329_s22 = sadd.s32 2, %s1314_s19 }
  0x34   : > { %s330_s23 = sld [smem:[#allocation5 + %s329_s22]] }
  0x3a   : > { %s331_s20 = scalar_lea.vmem %s1429_s2, %s330_s23 }
  0x3b   : > { %v352_v2 = vld [vmem:[%s331_s20] sm:$0x1] }
  0x3c   : > { %353 = vst [vmem:[#allocation2 + $0x2] sm:$0x1] %v352_v2 }
  0x3d   : > { %379 = vsyncadd [#allocation3 + $0x2], 16  ;;  %s380_s27 = sadd.s32 3, %s1314_s19 }
  0x3e   : > { %s381_s28 = sld [smem:[#allocation5 + %s380_s27]] }
  0x44   : > { %s382_s14 = scalar_lea.vmem %s1429_s2, %s381_s28 }
  0x45   : > { %v403_v3 = vld [vmem:[%s382_s14] sm:$0x1] }
  0x46   : > { %404 = vst [vmem:[#allocation2 + $0x3] sm:$0x1] %v403_v3 }
  0x47   : > { %430 = vsyncadd [#allocation3 + $0x3], 16  ;;  %s431_s17 = sadd.s32 4, %s1314_s19 }
  0x48   : > { %s432_s13 = sld [smem:[#allocation5 + %s431_s17]] }
  0x4e   : > { %s433_s23 = scalar_lea.vmem %s1429_s2, %s432_s13 }
  0x4f   : > { %v454_v4 = vld [vmem:[%s433_s23] sm:$0x1] }
  0x50   : > { %455 = vst [vmem:[#allocation2 + $0x4] sm:$0x1] %v454_v4 }
  0x51   : > { %481 = vsyncadd [#allocation3 + $0x4], 16  ;;  %s482_s24 = sadd.s32 5, %s1314_s19 }
  0x52   : > { %s483_s26 = sld [smem:[#allocation5 + %s482_s24]] }
  0x58   : > { %s484_s10 = scalar_lea.vmem %s1429_s2, %s483_s26 }
  0x59   : > { %v505_v5 = vld [vmem:[%s484_s10] sm:$0x1] }
  0x5a   : > { %506 = vst [vmem:[#allocation2 + $0x5] sm:$0x1] %v505_v5 }
  0x5b   : > { %532 = vsyncadd [#allocation3 + $0x5], 16  ;;  %s533_s28 = sadd.s32 6, %s1314_s19 }
  0x5c   : > { %s534_s12 = sld [smem:[#allocation5 + %s533_s28]] }
  0x62   : > { %s535_s13 = scalar_lea.vmem %s1429_s2, %s534_s12 }
  0x63   : > { %v556_v6 = vld [vmem:[%s535_s13] sm:$0x1] }
  0x64   : > { %557 = vst [vmem:[#allocation2 + $0x6] sm:$0x1] %v556_v6 }
  0x65   : > { %583 = vsyncadd [#allocation3 + $0x6], 16  ;;  %s584_s21 = sadd.s32 7, %s1314_s19 }
  0x66   : > { %s585_s22 = sld [smem:[#allocation5 + %s584_s21]] }
  0x6c   : > { %s586_s26 = scalar_lea.vmem %s1429_s2, %s585_s22 }
  0x6d   : > { %v607_v7 = vld [vmem:[%s586_s26] sm:$0x1] }
  0x6e   : > { %608 = vst [vmem:[#allocation2 + $0x7] sm:$0x1] %v607_v7 }
  0x6f   : > { %634 = vsyncadd [#allocation3 + $0x7], 16 }
  0x70   : > { %1175 = dma.done.wait [#allocation3], 16 }
  0x71   : > { %1176 = vsyncadd [#allocation3], 4294967280 }
  0x72   : > { %1177 = dma.done.wait [#allocation3 + $0x1], 16 }
  0x73   : > { %1178 = vsyncadd [#allocation3 + $0x1], 4294967280 }
  0x74   : > { %1179 = dma.done.wait [#allocation3 + $0x2], 16 }
  0x75   : > { %1180 = vsyncadd [#allocation3 + $0x2], 4294967280 }
  0x76   : > { %1181 = dma.done.wait [#allocation3 + $0x3], 16 }
  0x77   : > { %1182 = vsyncadd [#allocation3 + $0x3], 4294967280 }
  0x78   : > { %1183 = dma.done.wait [#allocation3 + $0x4], 16 }
  0x79   : > { %1184 = vsyncadd [#allocation3 + $0x4], 4294967280 }
  0x7a   : > { %1185 = dma.done.wait [#allocation3 + $0x5], 16 }
  0x7b   : > { %1186 = vsyncadd [#allocation3 + $0x5], 4294967280 }
  0x7c   : > { %1187 = dma.done.wait [#allocation3 + $0x6], 16 }
  0x7d   : > { %1188 = vsyncadd [#allocation3 + $0x6], 4294967280 }
  0x7e   : > { %1189 = dma.done.wait [#allocation3 + $0x7], 16 }
  0x7f   : > { %1190 = vsyncadd [#allocation3 + $0x7], 4294967280  ;;  %v1212_v8 = vmov 0.0   ;;  %vm1213_vm0 = vmmov 0   ;;  %v1214_v9 = vmov 0   ;;  %v1113_v10 = vld [vmem:[%s1430_s3 + $0x8] sm:$0xff]  }
  0x80   : > { %1053 = vmatprep.subr.bf16.mxu0 %v1212_v8  ;;  %1057 = vmatprep.mubr.msk.bf16.mxu0 %vm1213_vm0, %v1212_v8  ;;  %v1114_v11 = vld [vmem:[%s1430_s3] sm:$0xff]   ;;  %vm677_vm1 = vcmask 261120   ;;  %v1115_v15 = vld [vmem:[%s1432_s5 + $0x8] sm:$0xff]   ;;  %s1036_s23 = sshll.u32 %s1280_s9, 7  ;;  %s1439_s24 = scalar_lea.vmem [#allocation6], %s1311_s18 }
  0x81   : > { %1112 = vset.pattern.permute.xlu0 %v1214_v9  ;;  %1061 = vmatprep.subr.bf16.mxu1 %v1212_v8  ;;  %v652_v12 = vld [vmem:[#allocation2] sm:$0xff]  ;;  %s811_s26 = sshll.u32 %s1439_s24, 4  ;;  %s1382_s27 = scalar_lea.hbm %s1434_s7, %s1036_s23  ;;  %s1384_s26 = int_to_ptr.vmem [resolvable:$true] %s811_s26 }
  0x82   : > { %1065 = vmatprep.mubr.msk.bf16.mxu1 %vm1213_vm0, %v1212_v8  ;;  %1054 = vmatpush3.bf16.msra.mxu0 %v1113_v10  ;;  %v722_v13 = vld [vmem:[%s1321_s25] sm:$0xff]  ;;  %v653_v14 = vpack.c.bf16 %v652_v12, %v652_v12  ;;  %s1440_s10 = smov %s1439_s24  ;;  %s1441_s28 = sand.u32 1, %s1201_s30  }
  0x83   : > { %1055 = vmatprep.subr.bf16.mxu0 %v1212_v8  ;;  %725 = vperm.xlu0 %1112, %v722_v13   ;;  %v1116_v16 = vld [vmem:[%s1432_s5] sm:$0xff]   ;;  %s798_s9 = scalar_lea.sflag [#allocation7], %s1441_s28  ;;  %s1131_s12 = scalar_lea.vmem %s1384_s26, 128 }
  0x84   : > { %1062 = vmatpush3.bf16.msra.mxu1 %v1115_v15  ;;  %v1027_v17 = vld [vmem:[%s1431_s4] ss:$0 sm:$0xff]  ;;  %p1132_p2 = scmp.ne.s32.totalorder %s1384_s26, %s1131_s12  ;;  %s1215_s14 = smov [#allocation6]  }
  0x85   : > { %1063 = vmatprep.subr.bf16.mxu1 %v1212_v8  ;;  %v1031_v27 = vld [vmem:[%s1433_s6] ss:$0 sm:$0xff]  ;;  %s1135_s17 = sshll.u32 %s1215_s14, 4  ;;  %s1136_s17 = int_to_ptr.vmem [resolvable:$false] %s1135_s17 }
  0x86   : > { %1056 = vmatpush3.bf16.msra.mxu0 %v1114_v11  ;;  %p1133_p3 = pnand %p1132_p2, %p1297_p10  ;;  %s1137_s25 = scalar_lea.vmem %s1136_s17, 256 }
  0x87   : > { %p1138_p5 = scmp.lt.s32.totalorder %s1384_s26, %s1136_s17  ;;  %p1139_p6 = scmp.lt.s32.totalorder %s1137_s25, %s1131_s12 }
  0x88   : > { %1064 = vmatpush3.bf16.msra.mxu1 %v1116_v16  ;;  %p1134_p4 = pneg %p1133_p3 }
  0x89   : > { %1058 = vmatmul.mubr.msk.bf16.vlgmr.msra.gmra.mxu0 %vm677_vm1, %v653_v14  ;;  %p1140_p7 = por %p1139_p6, %p1138_p5 }
  0x8b   : > { %p1141_p8 = pnand %p1140_p7, %p1134_p4 }
  0xfe   : > { %v726_v23 = vpop.permute.xlu0 %725 }
 0x149   : > { %v715_v18 = vpop.f32.mrf.mxu0 }
 0x14a   : > { %v716_v19 = vadd.f32 %v1027_v17, %v715_v18 }
 0x14b   : > { %v1059_v20 = vpop.f32.mrf.mxu0 }
 0x14c   : > { %1117 = vtanh.f32 %v716_v19 }
 0x14d   : > { %v718_v21 = vpop.f32.mrf.mxu0 }
 0x14f   : > { %v1060_v22 = vpop.f32.mrf.mxu0 }
 0x159   : > { %v1118_v24 = vpop.eup %1117 }
 0x15a   : > { %v728_v25 = vmul.f32 %v1118_v24, %v726_v23 }
 0x15c   : > { %v729_v26 = vpack.c.bf16 %v728_v25, %v728_v25 }
 0x15e   : > { %1066 = vmatmul.mubr.msk.bf16.vlgmr.msra.gmra.mxu1 %vm677_vm1, %v729_v26 }
 0x21e   : > { %v790_v28 = vpop.f32.mrf.mxu1 }
 0x21f   : > { %v791_v29 = vadd.f32 %v1031_v27, %v790_v28 }
 0x220   : > { %v1067_v30 = vpop.f32.mrf.mxu1 }
 0x221   : > { %796 = vst [vmem:[%s1440_s10] sm:$0xff] %v791_v29 }
 0x222   : > { %v793_v31 = vpop.f32.mrf.mxu1 }
 0x223   : > { %1144 = shalt.err (!%p1141_p8)
}
 0x224   : > { %s1145_s18 = scalar_lea.hbm %s1382_s27, 128  ;;  %s1149_s22 = scalar_lea.hbm %s1434_s7, 256 }
 0x225   : > { %p1146_p9 = scmp.ne.s32.totalorder %s1382_s27, %s1145_s18  ;;  %p1150_p0 = scmp.lt.s32.totalorder %s1382_s27, %s1434_s7 }
 0x226   : > { %p1151_p1 = scmp.lt.s32.totalorder %s1149_s22, %s1145_s18 }
 0x227   : > { %p1147_p12 = pnand %p1146_p9, %p1297_p10 }
 0x228   : > { %p1152_p2 = por %p1151_p1, %p1150_p0 }
 0x229   : > { %p1148_p13 = pneg %p1147_p12 }
 0x22b   : > { %p1153_p3 = pnand %p1152_p2, %p1148_p13 }
 0x22d   : > { %1156 = shalt.err (!%p1153_p3)
}
 0x22e   : > { %1069 = dma.vmem_to_hbm [thread:$0]  (%p1297_p10), %s1384_s26, 128, %s1382_s27, %s798_s9   ;;  %v1068_v32 = vpop.f32.mrf.mxu1 }
 0x22f PF: > { %p1075_p4 = scmp.ge.s32.totalorder %s1209_s8, 2  ;;  %s823_s19 = sand.u32 1, %s1197_s29  }
 0x230   : > { %s824_s20 = scalar_lea.sflag [#allocation7], %s823_s19 }
 0x231   : > { %p1072_p5 = pnand %p1075_p4, %p1301_p11 }
 0x233   : > { %p1073_p6 = pneg %p1072_p5 }
 0x235   : > { %1192 = dma.done.wait (%p1073_p6), %s824_s20, 128  }
 0x236   : > { %1194 = vsyncadd (%p1073_p6), %s824_s20, 4294967168  ;;  %s1442_s15 = sld [smem:[#allocation26_spill]]  ;;  %p23_p7 = scmp.ge.s32.totalorder %s1284_s11, 4  }
 0x237   : > { %s1443_s29 = smov %s1201_s30  ;;  %s1444_s30 = smov %s1205_s0 }
 0x238   : > { %s1446_s8 = smov %s1284_s11  ;;  %25 = sbr.rel (!%p23_p7) target bundleno = 18 (0x12), region = 424 }
 0x23c   : > { %s1445_s0 = smov %s1442_s15 }
 0x23d   :  { %829 = vsyncpa [#allocation7], 1 }
 0x23e   :  { %831 = vsyncpa [#allocation7 + $0x1], 1 }
 0x23f   :  { %832 = vsyncmov [#allocation3] }
 0x242   :  { %s833_s8 = vpop.sfrf %832 }
 0x243   :  { %p1039_p10 = scmp.ne.s32.totalorder %s833_s8, 0 }
 0x245   :  { %837 = shalt.err (%p1039_p10)  }
 0x246   :  { %839 = vsyncmov [#allocation3 + $0x1] }
 0x249   :  { %s840_s16 = vpop.sfrf %839 }
 0x24a   :  { %p1040_p11 = scmp.ne.s32.totalorder %s840_s16, 0 }
 0x24c   :  { %844 = shalt.err (%p1040_p11)  }
 0x24d   :  { %846 = vsyncmov [#allocation3 + $0x2] }
 0x250   :  { %s847_s26 = vpop.sfrf %846 }
 0x251   :  { %p1041_p8 = scmp.ne.s32.totalorder %s847_s26, 0 }
 0x253   :  { %851 = shalt.err (%p1041_p8)  }
 0x254   :  { %853 = vsyncmov [#allocation3 + $0x3] }
 0x257   :  { %s854_s27 = vpop.sfrf %853 }
 0x258   :  { %p1042_p9 = scmp.ne.s32.totalorder %s854_s27, 0 }
 0x25a   :  { %858 = shalt.err (%p1042_p9)  }
 0x25b   :  { %860 = vsyncmov [#allocation3 + $0x4] }
 0x25e   :  { %s861_s11 = vpop.sfrf %860 }
 0x25f   :  { %p1043_p12 = scmp.ne.s32.totalorder %s861_s11, 0 }
 0x261   :  { %865 = shalt.err (%p1043_p12)  }
 0x262   :  { %867 = vsyncmov [#allocation3 + $0x5] }
 0x265   :  { %s868_s1 = vpop.sfrf %867 }
 0x266   :  { %p1044_p13 = scmp.ne.s32.totalorder %s868_s1, 0 }
 0x268   :  { %872 = shalt.err (%p1044_p13)  }
 0x269   :  { %874 = vsyncmov [#allocation3 + $0x6] }
 0x26c   :  { %s875_s2 = vpop.sfrf %874 }
 0x26d   :  { %p1045_p0 = scmp.ne.s32.totalorder %s875_s2, 0 }
 0x26f   :  { %879 = shalt.err (%p1045_p0)  }
 0x270   :  { %881 = vsyncmov [#allocation3 + $0x7] }
 0x273   :  { %s882_s3 = vpop.sfrf %881 }
 0x274   :  { %p1046_p1 = scmp.ne.s32.totalorder %s882_s3, 0 }
 0x276   :  { %886 = shalt.err (%p1046_p1)  }

</bundles_post_ra>
